<compile_context>
chip_gen: v7x
topology: tpu7x:2x2x1
jax: 0.10.0
libtpu: 0.0.40
codegen_flags: <defaults>
</compile_context>

<pallas_src>
import functools
from types import SimpleNamespace

import jax
import jax.numpy as jnp
from jax.experimental import pallas as pl
from jax.experimental.pallas import tpu as pltpu

_VMEM_LIMIT_BYTES = 48 * 1024 * 1024      # safe on v5e/v6e (128 MiB) and v7x (64 MiB)
_TARGET_BLOCK_BYTES = 2 * 1024 * 1024     # per-buffer tile budget (double-buffered by Pallas)
_MAX_LANE_BLOCK = 2048                    # multiple of 128


# ---------------------------------------------------------------------------
# Block-size selection
# ---------------------------------------------------------------------------
def _pick_lane_block(cols):
    """Lane (last-dim) block: full extent if small, else a multiple of 128."""
    if cols <= _MAX_LANE_BLOCK:
        return cols                       # full array dim is always legal
    return _MAX_LANE_BLOCK                # multiple of 128; cdiv grid covers remainder


def _pick_row_block(rows, lane_block, elem_bytes=4):
    """Row (sublane) block: ~_TARGET_BLOCK_BYTES per buffer, multiple of 8."""
    br = max(8, _TARGET_BLOCK_BYTES // (lane_block * elem_bytes))
    if br >= rows:
        return rows                       # full array dim is always legal
    return max(8, (br // 8) * 8)


# ---------------------------------------------------------------------------
# Pallas kernels
# ---------------------------------------------------------------------------
def _row_stats_kernel(x_ref, sum_ref, sq_ref, *, rows, cols, need_mask):
    """Per-row sum and sum-of-squares, accumulated over the lane-axis grid."""
    j = pl.program_id(1)

    @pl.when(j == 0)
    def _():
        sum_ref[...] = jnp.zeros_like(sum_ref)
        sq_ref[...] = jnp.zeros_like(sq_ref)

    x = x_ref[...].astype(jnp.float32)
    if need_mask:
        # Mask out-of-bounds elements of partial edge blocks so padded garbage
        # never pollutes the sums.
        i = pl.program_id(0)
        br, bc = x.shape
        rid = i * br + jax.lax.broadcasted_iota(jnp.int32, (br, bc), 0)
        cid = j * bc + jax.lax.broadcasted_iota(jnp.int32, (br, bc), 1)
        x = jnp.where((rid < rows) & (cid < cols), x, 0.0)

    sum_ref[...] += jnp.sum(x, axis=1, keepdims=True)
    sq_ref[...] += jnp.sum(x * x, axis=1, keepdims=True)


def _affine_norm_kernel(x_ref, scale_ref, shift_ref, o_ref):
    """y = x * scale + shift with per-row (sublane-broadcast) scale/shift."""
    x = x_ref[...].astype(jnp.float32)
    o_ref[...] = (x * scale_ref[...] + shift_ref[...]).astype(o_ref.dtype)


# ---------------------------------------------------------------------------
# Pallas call wrappers
# ---------------------------------------------------------------------------
def _channel_stats(x2d, n, c):
    """Per-channel (sum, sum_sq) for x2d of shape (N*C, H*W) laid out NCHW."""
    rows, cols = x2d.shape
    bc = _pick_lane_block(cols)
    br = _pick_row_block(rows, bc)
    grid = (pl.cdiv(rows, br), pl.cdiv(cols, bc))
    need_mask = (rows % br != 0) or (cols % bc != 0)
    kern = functools.partial(_row_stats_kernel, rows=rows, cols=cols,
                             need_mask=need_mask)

    rsum, rsq = pl.pallas_call(
        kern,
        out_shape=(
            jax.ShapeDtypeStruct((rows, 1), jnp.float32),
            jax.ShapeDtypeStruct((rows, 1), jnp.float32),
        ),
        grid_spec=pltpu.PrefetchScalarGridSpec(
            num_scalar_prefetch=0,
            grid=grid,
            in_specs=[pl.BlockSpec((br, bc), lambda i, j: (i, j))],
            out_specs=[
                pl.BlockSpec((br, 1), lambda i, j: (i, 0)),
                pl.BlockSpec((br, 1), lambda i, j: (i, 0)),
            ],
        ),
        compiler_params=pltpu.CompilerParams(
            # row axis "parallel" (megacore-shardable on v7x), reduction axis
            # last and "arbitrary" (output block resident across it).
            dimension_semantics=("parallel", "arbitrary"),
            vmem_limit_bytes=_VMEM_LIMIT_BYTES,
        ),
    )(x2d)

    # Tiny (N*C,) -> (C,) fold; rows are ordered (n, c) with c fastest.
    ch_sum = jnp.sum(rsum.reshape(n, c), axis=0)
    ch_sq = jnp.sum(rsq.reshape(n, c), axis=0)
    return ch_sum, ch_sq


def _normalize(x2d, scale_rows, shift_rows):
    """y = x * scale + shift, streamed with ~2 MiB lane-dense tiles."""
    rows, cols = x2d.shape
    bc = _pick_lane_block(cols)
    br = _pick_row_block(rows, bc)
    grid = (pl.cdiv(rows, br), pl.cdiv(cols, bc))

    return pl.pallas_call(
        _affine_norm_kernel,
        out_shape=jax.ShapeDtypeStruct((rows, cols), x2d.dtype),
        grid_spec=pltpu.PrefetchScalarGridSpec(
            num_scalar_prefetch=0,
            grid=grid,
            in_specs=[
                pl.BlockSpec((br, bc), lambda i, j: (i, j)),
                pl.BlockSpec((br, 1), lambda i, j: (i, 0)),
                pl.BlockSpec((br, 1), lambda i, j: (i, 0)),
            ],
            out_specs=pl.BlockSpec((br, bc), lambda i, j: (i, j)),
        ),
        compiler_params=pltpu.CompilerParams(
            dimension_semantics=("parallel", "parallel"),
            vmem_limit_bytes=_VMEM_LIMIT_BYTES,
        ),
    )(x2d, scale_rows, shift_rows)


# ---------------------------------------------------------------------------
# MetaBNLayer equivalent (forward semantics of the PyTorch module)
# ---------------------------------------------------------------------------
def extract_top_level_dict(current_dict):
    output_dict = dict()
    for key in current_dict.keys():
        name = key.replace("layer_dict.", "")
        top_level = name.split(".")[0]
        sub_level = ".".join(name.split(".")[1:])
        if top_level not in output_dict:
            if sub_level == "":
                output_dict[top_level] = current_dict[key]
            else:
                output_dict[top_level] = {sub_level: current_dict[key]}
        else:
            new_item = {k: v for k, v in output_dict[top_level].items()}
            new_item[sub_level] = current_dict[key]
            output_dict[top_level] = new_item
    return output_dict


class MetaBNLayerPallas:
    def __init__(self, num_features, args, eps=1e-5, momentum=0.1, affine=True,
                 track_running_stats=True, meta_batch_norm=True,
                 use_per_step_bn_statistics=False):
        self.num_features = num_features
        self.eps = eps
        self.momentum = momentum
        self.affine = affine
        self.track_running_stats = track_running_stats
        self.meta_batch_norm = meta_batch_norm
        self.use_per_step_bn_statistics = use_per_step_bn_statistics
        self.args = args
        self.learnable_gamma = args.learnable_bn_gamma
        self.learnable_beta = args.learnable_bn_beta
        if use_per_step_bn_statistics:
            steps = args.number_of_training_steps_per_iter
            self.r_mean = jnp.zeros((steps, num_features), jnp.float32)
            self.r_var = jnp.ones((steps, num_features), jnp.float32)
            self.bias = jnp.zeros((steps, num_features), jnp.float32)
            self.weight = jnp.ones((steps, num_features), jnp.float32)
        else:
            self.r_mean = jnp.zeros((num_features,), jnp.float32)
            self.r_var = jnp.ones((num_features,), jnp.float32)
            self.bias = jnp.zeros((num_features,), jnp.float32)
            self.weight = jnp.ones((num_features,), jnp.float32)
        self.bkp_r_mean = jnp.zeros(self.r_mean.shape, jnp.float32)
        self.bkp_r_var = jnp.ones(self.r_var.shape, jnp.float32)

    def forward(self, x_nchw, current_step, params=None, training=False,
                bkp_running_statistics=False):
        if params is not None:
            params = extract_top_level_dict(params)
            weight, bias = params["weight"], params["bias"]
        else:
            weight, bias = self.weight, self.bias

        if self.use_per_step_bn_statistics:
            r_mean = self.r_mean[current_step]
            r_var = self.r_var[current_step]
            if params is None and not self.args.enable_inner_loop_optimizable_bn_params:
                bias = self.bias[current_step]
                weight = self.weight[current_step]
        else:
            r_mean = self.r_mean
            r_var = self.r_var

        if bkp_running_statistics and self.use_per_step_bn_statistics:
            self.bkp_r_mean = self.r_mean
            self.bkp_r_var = self.r_var

        if not training:
            # Eval mode uses the module-level running statistics.
            # TODO(synk): with use_per_step_bn_statistics the PyTorch code hands the
            # full (steps, C) tensor to F.batch_norm (which would error); we use the
            # current step's row instead.
            r_mean = self.r_mean if self.r_mean.ndim == 1 else self.r_mean[current_step]
            r_var = self.r_var if self.r_var.ndim == 1 else self.r_var[current_step]

        n, c, h, w = x_nchw.shape
        hw = h * w
        rows = n * c
        # NCHW is contiguous: this reshape is free (no transpose, no HBM pass).
        x2d = x_nchw.reshape(rows, hw)

        if training:
            # Batch statistics via the Pallas reduction (biased variance for
            # normalization, unbiased for the running-stat update, like F.batch_norm).
            # Note: sum/sum-of-squares in f32 can lose precision for very large
            # N*H*W (E[x^2]-E[x]^2 cancellation); clamped at 0.
            ch_sum, ch_sq = _channel_stats(x2d, n, c)
            cnt = jnp.float32(n * hw)
            mean = ch_sum / cnt
            var_b = jnp.maximum(ch_sq / cnt - mean * mean, 0.0)
            var_u = var_b * cnt / jnp.maximum(cnt - 1.0, 1.0)
            new_r_mean = (1 - self.momentum) * r_mean + self.momentum * mean
            new_r_var = (1 - self.momentum) * r_var + self.momentum * var_u
            # TODO(synk): stateful running-stat update; does not persist under jax.jit.
            if self.use_per_step_bn_statistics:
                self.r_mean = self.r_mean.at[current_step].set(new_r_mean)
                self.r_var = self.r_var.at[current_step].set(new_r_var)
            else:
                self.r_mean = new_r_mean
                self.r_var = new_r_var
            use_mean, use_var = mean, var_b
        else:
            use_mean, use_var = r_mean, r_var

        # Fold all per-channel work into scale/shift (tiny C-length host-side math).
        scale = weight.astype(jnp.float32) * jax.lax.rsqrt(
            use_var.astype(jnp.float32) + self.eps)
        shift = bias.astype(jnp.float32) - use_mean.astype(jnp.float32) * scale
        # Row r of x2d is (sample r // C, channel r % C) -> tile along samples.
        scale_rows = jnp.tile(scale, n).reshape(rows, 1)
        shift_rows = jnp.tile(shift, n).reshape(rows, 1)

        y2d = _normalize(x2d, scale_rows, shift_rows)
        return y2d.reshape(n, c, h, w)

    def restore_bkp_stats(self):
        if self.use_per_step_bn_statistics:
            self.r_mean = self.bkp_r_mean
            self.r_var = self.bkp_r_var


# ---------------------------------------------------------------------------
# Reference (plain JAX) batch norm for verification
# ---------------------------------------------------------------------------
def _ref_batch_norm(x, mean, var, weight, bias, eps):
    m = mean.reshape(1, -1, 1, 1)
    v = var.reshape(1, -1, 1, 1)
    g = weight.reshape(1, -1, 1, 1)
    b = bias.reshape(1, -1, 1, 1)
    return (x - m) / jnp.sqrt(v + eps) * g + b


if __name__ == "__main__":
    args = SimpleNamespace(
        learnable_bn_gamma=True,
        learnable_bn_beta=True,
        number_of_training_steps_per_iter=5,
        enable_inner_loop_optimizable_bn_params=False,
    )

    num_features = 4
    layer = MetaBNLayerPallas(num_features, args, eps=1e-5, momentum=0.1)

    key = jax.random.PRNGKey(0)
    kx, kw, kb, kx2 = jax.random.split(key, 4)
    x = jax.random.normal(kx, (2, 4, 16, 16), dtype=jnp.float32)

    # external params (as the meta-learning inner loop would pass them)
    ext_params = {
        "weight": 1.0 + 0.1 * jax.random.normal(kw, (num_features,), jnp.float32),
        "bias": 0.1 * jax.random.normal(kb, (num_features,), jnp.float32),
    }

    # --- eval path (training=False): uses running stats ---
    y_eval = layer.forward(x, current_step=0, params=ext_params, training=False)
    y_eval = jax.block_until_ready(y_eval)
    ref_eval = _ref_batch_norm(x, layer.r_mean, layer.r_var,
                               ext_params["weight"], ext_params["bias"], layer.eps)
    assert jnp.allclose(y_eval, ref_eval, atol=1e-5, rtol=1e-5)

    # --- training path: uses batch statistics from the Pallas reduction ---
    y_train = layer.forward(x, current_step=0, params=ext_params, training=True)
    y_train = jax.block_until_ready(y_train)
    bm = jnp.mean(x, axis=(0, 2, 3))
    bv = jnp.var(x, axis=(0, 2, 3))
    ref_train = _ref_batch_norm(x, bm, bv, ext_params["weight"], ext_params["bias"],
                                layer.eps)
    assert jnp.allclose(y_train, ref_train, atol=1e-4, rtol=1e-4)

    # running-stat update (momentum 0.1, unbiased variance), like F.batch_norm
    cnt = float(x.shape[0] * x.shape[2] * x.shape[3])
    bv_unbiased = bv * cnt / (cnt - 1.0)
    assert jnp.allclose(layer.r_mean, 0.1 * bm, atol=1e-5, rtol=1e-5)
    assert jnp.allclose(layer.r_var, 0.9 * 1.0 + 0.1 * bv_unbiased, atol=1e-5, rtol=1e-5)

    # --- odd (non-aligned) shapes use full-extent blocks and still match ---
    layer2 = MetaBNLayerPallas(3, args, eps=1e-5, momentum=0.1)
    x2 = jax.random.normal(kx2, (2, 3, 5, 7), dtype=jnp.float32)
    y2 = layer2.forward(x2, current_step=0, params=None, training=True)
    y2 = jax.block_until_ready(y2)
    bm2 = jnp.mean(x2, axis=(0, 2, 3))
    bv2 = jnp.var(x2, axis=(0, 2, 3))
    ref2 = _ref_batch_norm(x2, bm2, bv2, layer2.weight, layer2.bias, layer2.eps)
    assert jnp.allclose(y2, ref2, atol=1e-4, rtol=1e-4)

    print("KERNEL_OK")
</pallas_src>

<mosaic_0001>
module attributes {stable_mosaic.version = 11 : i64} {
  func.func @_affine_norm_kernel(%arg0: i32, %arg1: i32, %arg2: memref<8x256xf32, #tpu.memory_space<vmem>>, %arg3: memref<8x1xf32, #tpu.memory_space<vmem>>, %arg4: memref<8x1xf32, #tpu.memory_space<vmem>>, %arg5: memref<8x256xf32, #tpu.memory_space<vmem>>) attributes {dimension_semantics = [#tpu.dimension_semantics<parallel>, #tpu.dimension_semantics<parallel>], iteration_bounds = array<i64: 1, 1>, scalar_prefetch = 0 : i64, scratch_operands = 0 : i64, tpu.core_type = #tpu.core_type<tc>, window_params = [{transform_indices = @transform_0, window_bounds = array<i64: 8, 256>}, {transform_indices = @transform_1, window_bounds = array<i64: 8, 1>}, {transform_indices = @transform_2, window_bounds = array<i64: 8, 1>}, {transform_indices = @transform_3, window_bounds = array<i64: 8, 256>}]} {
    %c0 = arith.constant 0 : index
    %c0_0 = arith.constant 0 : index
    %0 = vector.load %arg2[%c0, %c0_0] : memref<8x256xf32, #tpu.memory_space<vmem>>, vector<8x256xf32>
    %c0_1 = arith.constant 0 : index
    %c0_2 = arith.constant 0 : index
    %1 = vector.load %arg3[%c0_1, %c0_2] : memref<8x1xf32, #tpu.memory_space<vmem>>, vector<8x1xf32>
    %2 = vector.broadcast %1 : vector<8x1xf32> to vector<8x256xf32>
    %3 = arith.mulf %0, %2 : vector<8x256xf32>
    %c0_3 = arith.constant 0 : index
    %c0_4 = arith.constant 0 : index
    %4 = vector.load %arg4[%c0_3, %c0_4] : memref<8x1xf32, #tpu.memory_space<vmem>>, vector<8x1xf32>
    %5 = vector.broadcast %4 : vector<8x1xf32> to vector<8x256xf32>
    %6 = arith.addf %3, %5 : vector<8x256xf32>
    %c0_5 = arith.constant 0 : index
    %c0_6 = arith.constant 0 : index
    %7 = vector.load %arg5[%c0_5, %c0_6] : memref<8x256xf32, #tpu.memory_space<vmem>>, vector<8x256xf32>
    tpu.vector_store %arg5[%c0_5, %c0_6], %6 {strides = array<i32>} : memref<8x256xf32, #tpu.memory_space<vmem>>, vector<8x256xf32>,
    return
  }
  func.func @transform_0(%arg0: i32, %arg1: i32) -> (i32, i32) {
    %c0_i32 = arith.constant 0 : i32
    return %arg0, %arg1 : i32, i32
  }
  func.func @transform_1(%arg0: i32, %arg1: i32) -> (i32, i32) {
    %c0_i32 = arith.constant 0 : i32
    %c0_i32_0 = arith.constant 0 : i32
    return %arg0, %c0_i32 : i32, i32
  }
  func.func @transform_2(%arg0: i32, %arg1: i32) -> (i32, i32) {
    %c0_i32 = arith.constant 0 : i32
    %c0_i32_0 = arith.constant 0 : i32
    return %arg0, %c0_i32 : i32, i32
  }
  func.func @transform_3(%arg0: i32, %arg1: i32) -> (i32, i32) {
    %c0_i32 = arith.constant 0 : i32
    return %arg0, %arg1 : i32, i32
  }
}

</mosaic_0001>

<bundles_post_ra>
// kernel: tpu_custom_call.1
= control target key start
LH: loop header
LB: loop body
LE: loop exit
PB: predicated region body
PF: predicated region fallthrough
CT: control target
= control target key end

     0   :  { %s122_s0 = inlined_call_operand.vmem [shape: f32[8,256], index: 0, kind: input, shape index: {}]   ;;  %s123_s1 = inlined_call_operand.vmem [shape: f32[8,1], index: 1, kind: input, shape index: {}]   ;;  %s124_s2 = inlined_call_operand.vmem [shape: f32[8,1], index: 2, kind: input, shape index: {}]   ;;  %s125_s3 = inlined_call_operand.hbm [shape: f32[8,256], index: 3, kind: output, shape index: {}]  }
   0x1   :  { %v17_v0 = vld [vmem:[%s123_s1] sm:$0xff] }
   0x2   :  { %8 = vsyncpa [#allocation3], 0  ;;  %v76_v1 = vmov 0   ;;  %v25_v2 = vld [vmem:[%s124_s2] sm:$0xff]  ;;  %v16_v5 = vld [vmem:[%s122_s0 + $0x8] sm:$0xff]  ;;  %s77_s20 = smov [#allocation2]  }
   0x3   :  { %51 = vset.pattern.permute.xlu0 %v76_v1  ;;  %v15_v4 = vld [vmem:[%s122_s0] sm:$0xff]  ;;  %s41_s1 = sshll.u32 %s77_s20, 4  ;;  %s42_s1 = int_to_ptr.vmem [resolvable:$true] %s41_s1 }
   0x4   :  { %20 = vperm.xlu0 %51, %v17_v0   ;;  %s52_s2 = scalar_lea.vmem %s42_s1, 256  ;;  %p57_p1 = scmp.lt.s32.totalorder %s42_s1, %s42_s1 }
   0x5   :  { %p53_p0 = scmp.ne.s32.totalorder %s42_s1, %s52_s2  ;;  %p58_p2 = scmp.lt.s32.totalorder %s52_s2, %s52_s2 }
   0x7   :  { %p59_p3 = por %p58_p2, %p57_p1 }
   0x8   :  { %28 = vperm.xlu0 %51, %v25_v2  }
   0x9   :  { %p60_p4 = pnand %p59_p3, %p53_p0 }
  0x83   :  { %v21_v3 = vpop.permute.xlu0 %20 }
  0x84   :  { %v23_v6 = vmul.f32 %v21_v3, %v15_v4  ;;  %v24_v7 = vmul.f32 %v21_v3, %v16_v5 }
  0x87   :  { %v29_v8 = vpop.permute.xlu0 %28 }
  0x88   :  { %v31_v9 = vadd.f32 %v29_v8, %v23_v6  ;;  %v32_v10 = vadd.f32 %v29_v8, %v24_v7 }
  0x8a   :  { %33 = vst [vmem:[#allocation2] sm:$0xff] %v31_v9  ;;  %34 = vst [vmem:[#allocation2 + $0x8] sm:$0xff] %v32_v10 }
  0x8b   :  { %63 = shalt.err (!%p60_p4)
}
  0x8c   :  { %s64_s0 = scalar_lea.hbm %s125_s3, 256 }
  0x8d   :  { %p65_p5 = scmp.ne.s32.totalorder %s125_s3, %s64_s0  ;;  %p68_p6 = scmp.lt.u32.totalorder %s64_s0, %s125_s3 }
  0x8f   :  { %p70_p7 = pnand %p68_p6, %p65_p5 }
  0x91   :  { %73 = shalt.err (!%p70_p7)
}
  0x92   :  { %44 = dma.vmem_to_hbm [thread:$0]  %s42_s1, 256, %s125_s3, [#allocation3]  }
  0x93   :  { %74 = dma.done.wait [#allocation3], 256  }
  0x94   :  { %75 = vsyncadd [#allocation3], 4294967040 }
  0x95   :  { %48 = vsyncpa [#allocation3], 1 }

</bundles_post_ra>
